<compile_context>
chip_gen: v7x
topology: tpu7x:2x2x1
jax: 0.10.0
libtpu: 0.0.40
codegen_flags: <defaults>
</compile_context>

<pallas_src>
import math
import functools

import jax
import jax.numpy as jnp
from jax.experimental import pallas as pl
from jax.experimental.pallas import tpu as pltpu


def _attn_kernel(x_full_ref, x_q_ref, wqkv_ref, bqkv_ref, wo_ref, bo_ref, mask_ref,
                 *out_and_scratch, approx_recip, store_weights):
    """One (batch-tile b, query-tile qt, head h) grid step.

    Blocks:
      x_full_ref  (Bt, T, E)      activations, full sequence (for K/V)
      x_q_ref     (Bt, TQ, E)     activations, this query tile (for Q)
      wqkv_ref    (1, 3, E, D)    this head's q|k|v weight slabs (q pre-scaled)
      bqkv_ref    (1, 3, 1, D)    this head's q|k|v biases (f32, q pre-scaled)
      wo_ref      (1, D, E)       this head's rows of the output projection
      bo_ref      (1, E)          output-projection bias (f32)
      mask_ref    (Bm, TQ, T)     additive attention mask (f32), Bm in {1, Bt}
      out_ref     (Bt, TQ, E)     attention output (accumulated over heads)
      weights_ref (Bt, 1, TQ, T)  per-head softmax probabilities (optional)
      acc_ref     (Bt*TQ, E) f32  VMEM accumulator for the head-folded out-proj
    """
    if store_weights:
        out_ref, weights_ref, acc_ref = out_and_scratch
    else:
        out_ref, acc_ref = out_and_scratch
        weights_ref = None

    h = pl.program_id(2)
    num_heads = pl.num_programs(2)

    Bt, T, E = x_full_ref.shape
    TQ = x_q_ref.shape[1]
    D = wo_ref.shape[1]
    compute_dtype = x_full_ref.dtype

    # Fold Bt batches into the matmul M dimension (fills the 256-wide MXU).
    x_full = x_full_ref[...].reshape(Bt * T, E)
    x_q = x_q_ref[...].reshape(Bt * TQ, E)

    # Per-head projections: three lane-aligned (E, D) slabs, f32 accumulation.
    # 1/sqrt(head_dim) is already folded into wq / bq at param-prep time.
    q = jnp.dot(x_q, wqkv_ref[0, 0], preferred_element_type=jnp.float32) + bqkv_ref[0, 0]
    k = jnp.dot(x_full, wqkv_ref[0, 1], preferred_element_type=jnp.float32) + bqkv_ref[0, 1]
    v = jnp.dot(x_full, wqkv_ref[0, 2], preferred_element_type=jnp.float32) + bqkv_ref[0, 2]

    q = q.astype(compute_dtype).reshape(Bt, TQ, D)
    k = k.astype(compute_dtype).reshape(Bt, T, D)
    v = v.astype(compute_dtype).reshape(Bt, T, D)

    # Scores for this query tile against the full key sequence.
    s = jnp.einsum("bqd,bkd->bqk", q, k,
                   preferred_element_type=jnp.float32)          # (Bt, TQ, T) f32
    s = s + mask_ref[...]                                       # broadcasts if Bm == 1

    # Numerically stable softmax, kept in f32 (v5e VPU/EUP have no bf16).
    s = s - jnp.max(s, axis=-1, keepdims=True)
    e = jnp.exp(s)
    denom = jnp.sum(e, axis=-1, keepdims=True)
    p = e * pl.reciprocal(denom, approx=approx_recip)           # (Bt, TQ, T) f32

    if store_weights:
        weights_ref[...] = p.astype(weights_ref.dtype).reshape(Bt, 1, TQ, T)

    # ctx = probs @ v, then fold this head's slice of the output projection
    # into the running accumulator (no head concat, no per-head HBM stores).
    ctx = jnp.einsum("bqk,bkd->bqd", p.astype(compute_dtype), v,
                     preferred_element_type=jnp.float32)        # (Bt, TQ, D)
    contrib = jnp.dot(ctx.reshape(Bt * TQ, D).astype(compute_dtype), wo_ref[0],
                      preferred_element_type=jnp.float32)       # (Bt*TQ, E)

    @pl.when(h == 0)
    def _():
        acc_ref[...] = contrib        # direct store: no zero-fill + add

    @pl.when(h > 0)
    def _():
        acc_ref[...] += contrib

    @pl.when(h == num_heads - 1)
    def _():
        out_ref[...] = (acc_ref[...] + bo_ref[...]).reshape(Bt, TQ, E).astype(out_ref.dtype)


def _prepare_params(params, num_heads, compute_dtype):
    """Fold the softmax scaling into wq/bq and pack weights head-major.

    q/k/v weights are packed as (H, 3, E, D) slabs so the kernel never slices
    the lane axis at non-128 boundaries (review item on lane alignment).
    """
    E = params["wq"].shape[0]
    D = E // num_heads
    scaling = D ** (-0.5)

    wq = params["wq"] * scaling
    bq = params["bq"] * scaling

    def cols_per_head(w):                 # (E_in, E_out) -> (H, E_in, D)
        return w.reshape(E, num_heads, D).transpose(1, 0, 2)

    def bias_per_head(b):                 # (1, E) -> (H, 1, D)
        return b.reshape(num_heads, D)[:, None, :]

    w_qkv = jnp.stack(
        [cols_per_head(wq), cols_per_head(params["wk"]), cols_per_head(params["wv"])],
        axis=1).astype(compute_dtype)                                # (H, 3, E, D)
    b_qkv = jnp.stack(
        [bias_per_head(bq), bias_per_head(params["bk"]), bias_per_head(params["bv"])],
        axis=1).astype(jnp.float32)                                  # (H, 3, 1, D)
    wo_h = params["wo"].reshape(num_heads, D, E).astype(compute_dtype)   # (H, D, E)
    bo = params["bo"].astype(jnp.float32)                                # (1, E)
    return w_qkv, b_qkv, wo_h, bo


def _largest_divisor_leq(n, cap):
    cap = max(1, min(n, cap))
    for d in range(cap, 0, -1):
        if n % d == 0:
            return d
    return 1


def _pick_q_tile(T, target=512):
    """Largest 16-aligned divisor of T that is <= target (or T itself)."""
    if T <= target:
        return T
    for d in range(min(T, target), 15, -1):
        if T % d == 0 and d % 16 == 0:
            return d
    return T


def unilm_mha_forward(query, params, attn_mask=None, *, num_heads,
                      compute_dtype=jnp.bfloat16, return_weights=True,
                      weights_dtype=None, q_tile=None, batch_tile=None):
    """Pallas implementation of UnilmMultiheadAttention.forward (self-attention).

    query:     (B, T, E) float32
    attn_mask: None, (T, T), (1, T, T) or (B, T, T) additive mask (broadcast
               over heads, like the module's `attn_weights += attn_mask`).
    returns:   (attn, attn_weights) with shapes (B, T, E) and (B, H, T, T);
               attn_weights is None when return_weights=False.
    """
    B, T, E = query.shape
    D = E // num_heads
    assert D * num_heads == E, "embed_dim must be divisible by num_heads"
    out_dtype = query.dtype

    if weights_dtype is None:
        # bf16 weights writeback on the fast path halves the dominant HBM term.
        weights_dtype = jnp.float32 if compute_dtype == jnp.float32 else jnp.bfloat16

    # --- mask normalization: batch-invariant masks stay (1, T, T) in HBM. ---
    if attn_mask is None:
        mask = jnp.zeros((1, T, T), jnp.float32)
    else:
        mask = jnp.asarray(attn_mask, jnp.float32)
        if mask.ndim == 2:
            mask = mask[None]
    assert mask.shape[-2:] == (T, T) and mask.shape[0] in (1, B)
    mask_batched = (mask.shape[0] == B) and (B != 1)

    # --- tiling ---
    TQ = q_tile if q_tile is not None else _pick_q_tile(T)
    assert T % TQ == 0, "q_tile must divide the sequence length"
    if batch_tile is None:
        batch_tile = _largest_divisor_leq(B, max(1, 512 // TQ))   # target M ~ 512 rows
    Bt = batch_tile
    assert B % Bt == 0, "batch_tile must divide the batch size"
    Bm = Bt if mask_batched else 1

    w_qkv, b_qkv, wo_h, bo = _prepare_params(params, num_heads, compute_dtype)
    x = query.astype(compute_dtype)
    approx_recip = (compute_dtype != jnp.float32)

    kernel = functools.partial(_attn_kernel,
                               approx_recip=approx_recip,
                               store_weights=return_weights)

    # --- VMEM budget: 2x per pipelined in/out block + scratch, clamped to the
    # physical VMEM of this TPU generation (v7x has only 64 MiB). ---
    cb = jnp.dtype(compute_dtype).itemsize
    in_bytes = (Bt * T * E * cb          # x (full sequence)
                + Bt * TQ * E * cb       # x (query tile)
                + 3 * E * D * cb         # per-head qkv weights
                + 3 * D * 4              # per-head qkv bias
                + D * E * cb             # per-head out-proj rows
                + E * 4                  # out-proj bias
                + Bm * TQ * T * 4)       # mask
    out_bytes = Bt * TQ * E * jnp.dtype(out_dtype).itemsize
    if return_weights:
        out_bytes += Bt * TQ * T * jnp.dtype(weights_dtype).itemsize
    scratch_bytes = Bt * TQ * E * 4
    budget = 2 * (in_bytes + out_bytes) + scratch_bytes + (2 << 20)
    try:
        cap = int(pltpu.get_tpu_info().vmem_capacity_bytes * 0.85)
    except Exception:
        cap = 64 * 1024 * 1024           # safe on every TPU generation
    vmem_limit = int(min(cap, max(32 * 1024 * 1024, budget)))

    mask_idx = ((lambda b, qt, h: (b, qt, 0)) if mask_batched
                else (lambda b, qt, h: (0, qt, 0)))
    # NOTE: if the per-head weight DMAs ever show as exposed latency, add
    # pipeline_mode=pl.Buffered(3) to the wqkv / wo BlockSpecs below.
    in_specs = [
        pl.BlockSpec((Bt, T, E), lambda b, qt, h: (b, 0, 0)),        # x, full T (K/V)
        pl.BlockSpec((Bt, TQ, E), lambda b, qt, h: (b, qt, 0)),      # x, query tile (Q)
        pl.BlockSpec((1, 3, E, D), lambda b, qt, h: (h, 0, 0, 0)),   # per-head qkv weights
        pl.BlockSpec((1, 3, 1, D), lambda b, qt, h: (h, 0, 0, 0)),   # per-head qkv bias
        pl.BlockSpec((1, D, E), lambda b, qt, h: (h, 0, 0)),         # per-head out-proj rows
        pl.BlockSpec((1, E), lambda b, qt, h: (0, 0)),               # out-proj bias
        pl.BlockSpec((Bm, TQ, T), mask_idx),                         # additive mask
    ]
    out_specs = (pl.BlockSpec((Bt, TQ, E), lambda b, qt, h: (b, qt, 0)),)
    out_shapes = (jax.ShapeDtypeStruct((B, T, E), out_dtype),)
    if return_weights:
        out_specs += (pl.BlockSpec((Bt, 1, TQ, T), lambda b, qt, h: (b, h, qt, 0)),)
        out_shapes += (jax.ShapeDtypeStruct((B, num_heads, T, T), weights_dtype),)

    out = pl.pallas_call(
        kernel,
        out_shape=out_shapes,
        grid_spec=pltpu.PrefetchScalarGridSpec(
            num_scalar_prefetch=0,
            grid=(B // Bt, T // TQ, num_heads),   # head axis = reduction (innermost)
            in_specs=in_specs,
            out_specs=out_specs,
            scratch_shapes=[pltpu.VMEM((Bt * TQ, E), jnp.float32)],
        ),
        compiler_params=pltpu.CompilerParams(
            dimension_semantics=("parallel", "parallel", "arbitrary"),
            vmem_limit_bytes=vmem_limit,
        ),
    )(x, x, w_qkv, b_qkv, wo_h, bo, mask)

    if return_weights:
        attn, attn_weights = out
        return attn, attn_weights
    attn = out[0] if isinstance(out, (tuple, list)) else out
    return attn, None


def _xavier_uniform(key, out_dim, in_dim, gain):
    bound = gain * math.sqrt(6.0 / (in_dim + out_dim))
    return jax.random.uniform(key, (out_dim, in_dim), jnp.float32, -bound, bound)


def init_params(key, embed_dim):
    """Deterministic parameter init mirroring reset_parameters() shapes."""
    ks = jax.random.split(key, 8)
    gain_qkv = 1.0 / math.sqrt(2.0)      # qkv_same_dim branch
    # nn.Linear weights are (out, in); we store the transpose (in, out) for x @ W.
    wq = _xavier_uniform(ks[0], embed_dim, embed_dim, gain_qkv).T
    wk = _xavier_uniform(ks[1], embed_dim, embed_dim, gain_qkv).T
    wv = _xavier_uniform(ks[2], embed_dim, embed_dim, gain_qkv).T
    wo = _xavier_uniform(ks[3], embed_dim, embed_dim, 1.0).T
    bb = 1.0 / math.sqrt(embed_dim)
    bq = jax.random.uniform(ks[4], (1, embed_dim), jnp.float32, -bb, bb)
    bk = jax.random.uniform(ks[5], (1, embed_dim), jnp.float32, -bb, bb)
    bv = jax.random.uniform(ks[6], (1, embed_dim), jnp.float32, -bb, bb)
    bo = jnp.zeros((1, embed_dim), jnp.float32)   # nn.init.constant_(out_proj.bias, 0)
    return dict(wq=wq, bq=bq, wk=wk, bk=bk, wv=wv, bv=bv, wo=wo, bo=bo)


def _reference_forward(query, params, attn_mask, *, num_heads):
    """Plain-JAX f32 reference identical to the PyTorch forward."""
    B, T, E = query.shape
    D = E // num_heads
    scaling = D ** (-0.5)
    q = (query @ params["wq"] + params["bq"]) * scaling
    k = query @ params["wk"] + params["bk"]
    v = query @ params["wv"] + params["bv"]
    q = q.reshape(B, T, num_heads, D).transpose(0, 2, 1, 3)
    k = k.reshape(B, T, num_heads, D).transpose(0, 2, 1, 3)
    v = v.reshape(B, T, num_heads, D).transpose(0, 2, 1, 3)
    w = jnp.einsum("bhqd,bhkd->bhqk", q, k) + attn_mask[:, None, :, :]
    w = jax.nn.softmax(w, axis=-1)
    a = jnp.einsum("bhqk,bhkd->bhqd", w, v)
    a = a.transpose(0, 2, 1, 3).reshape(B, T, E)
    a = a @ params["wo"] + params["bo"]
    return a, w


if __name__ == "__main__":
    B, T, E, H = 2, 16, 32, 4   # batch, seq, embed_dim, num_heads (head_dim = 8)

    root = jax.random.PRNGKey(0)
    k_params, k_x = jax.random.split(root, 2)

    params = init_params(k_params, E)
    query = jax.random.normal(k_x, (B, T, E), jnp.float32)

    # Batch-invariant causal additive mask, kept as (1, T, T) (not broadcast to
    # B in HBM; the kernel broadcasts it over the batch tile in-register).
    causal = jnp.tril(jnp.ones((T, T), jnp.float32))
    attn_mask = jnp.where(causal == 1.0, 0.0, -1e9)[None]               # (1, T, T)

    ref_attn, ref_w = _reference_forward(
        query, params, jnp.broadcast_to(attn_mask, (B, T, T)), num_heads=H)

    # 1) Exact-semantics path: f32 compute, f32 weights, 2 query tiles + folded batch.
    a32, w32 = unilm_mha_forward(query, params, attn_mask, num_heads=H,
                                 compute_dtype=jnp.float32,
                                 q_tile=8, batch_tile=2)
    jax.block_until_ready((a32, w32))
    assert a32.shape == (B, T, E) and w32.shape == (B, H, T, T)
    assert jnp.allclose(a32, ref_attn, atol=1e-4, rtol=1e-4)
    assert jnp.allclose(w32, ref_w, atol=1e-4, rtol=1e-4)

    # 2) Fast path: bf16 MXU operands, f32 accumulation/softmax, bf16 weights
    #    writeback (halves the dominant (B,H,T,T) HBM term).
    abf, wbf = unilm_mha_forward(query, params, attn_mask, num_heads=H,
                                 compute_dtype=jnp.bfloat16)
    jax.block_until_ready((abf, wbf))
    assert abf.shape == (B, T, E) and wbf.shape == (B, H, T, T)
    assert wbf.dtype == jnp.bfloat16
    assert jnp.allclose(abf, ref_attn, atol=5e-2, rtol=5e-2)
    assert jnp.allclose(wbf.astype(jnp.float32), ref_w, atol=5e-2, rtol=5e-2)

    # 3) attn_weights dropped entirely (biggest mem-bound win when the caller
    #    does not consume the probabilities).
    a_nw, w_nw = unilm_mha_forward(query, params, attn_mask, num_heads=H,
                                   compute_dtype=jnp.float32,
                                   return_weights=False, q_tile=8)
    jax.block_until_ready(a_nw)
    assert w_nw is None
    assert jnp.allclose(a_nw, ref_attn, atol=1e-4, rtol=1e-4)

    print("KERNEL_OK")
</pallas_src>

<mosaic_0001>
module attributes {stable_mosaic.version = 11 : i64} {
  func.func @_attn_kernel(%arg0: i32, %arg1: i32, %arg2: i32, %arg3: memref<2x16x32xf32, #tpu.memory_space<vmem>>, %arg4: memref<2x8x32xf32, #tpu.memory_space<vmem>>, %arg5: memref<1x3x32x8xf32, #tpu.memory_space<vmem>>, %arg6: memref<1x3x1x8xf32, #tpu.memory_space<vmem>>, %arg7: memref<1x8x32xf32, #tpu.memory_space<vmem>>, %arg8: memref<1x32xf32, #tpu.memory_space<vmem>>, %arg9: memref<1x8x16xf32, #tpu.memory_space<vmem>>, %arg10: memref<2x8x32xf32, #tpu.memory_space<vmem>>, %arg11: memref<2x1x8x16xf32, #tpu.memory_space<vmem>>, %arg12: memref<16x32xf32, #tpu.memory_space<vmem>>) attributes {dimension_semantics = [#tpu.dimension_semantics<parallel>, #tpu.dimension_semantics<parallel>, #tpu.dimension_semantics<arbitrary>], iteration_bounds = array<i64: 1, 2, 4>, scalar_prefetch = 0 : i64, scratch_operands = 1 : i64, tpu.core_type = #tpu.core_type<tc>, window_params = [{transform_indices = @transform_0, window_bounds = array<i64: 2, 16, 32>}, {transform_indices = @transform_1, window_bounds = array<i64: 2, 8, 32>}, {transform_indices = @transform_2, window_bounds = array<i64: 1, 3, 32, 8>}, {transform_indices = @transform_3, window_bounds = array<i64: 1, 3, 1, 8>}, {transform_indices = @transform_4, window_bounds = array<i64: 1, 8, 32>}, {pipeline_mode = #tpu.pipeline_mode<synchronous>, transform_indices = @transform_5, window_bounds = array<i64: 1, 32>}, {transform_indices = @transform_6, window_bounds = array<i64: 1, 8, 16>}, {transform_indices = @transform_7, window_bounds = array<i64: 2, 8, 32>}, {transform_indices = @transform_8, window_bounds = array<i64: 2, 1, 8, 16>}]} {
    %c0 = arith.constant 0 : index
    %c0_0 = arith.constant 0 : index
    %c0_1 = arith.constant 0 : index
    %0 = vector.load %arg3[%c0, %c0_0, %c0_1] : memref<2x16x32xf32, #tpu.memory_space<vmem>>, vector<2x16x32xf32>
    %1 = vector.shape_cast %0 : vector<2x16x32xf32> to vector<32x32xf32>
    %c0_2 = arith.constant 0 : index
    %c0_3 = arith.constant 0 : index
    %c0_4 = arith.constant 0 : index
    %2 = vector.load %arg4[%c0_2, %c0_3, %c0_4] : memref<2x8x32xf32, #tpu.memory_space<vmem>>, vector<2x8x32xf32>
    %3 = vector.shape_cast %2 : vector<2x8x32xf32> to vector<16x32xf32>
    %c0_5 = arith.constant 0 : index
    %c0_6 = arith.constant 0 : index
    %c0_7 = arith.constant 0 : index
    %c0_8 = arith.constant 0 : index
    %4 = vector.load %arg5[%c0_5, %c0_6, %c0_7, %c0_8] : memref<1x3x32x8xf32, #tpu.memory_space<vmem>>, vector<1x1x32x8xf32>
    %5 = vector.shape_cast %4 : vector<1x1x32x8xf32> to vector<32x8xf32>
    %cst = arith.constant dense<0.000000e+00> : vector<16x8xf32>
    %6 = tpu.matmul %3, %5, %cst {dimension_numbers = #tpu.dot_dimension_numbers<[1], [0], [0], [1], [0, 0, 1, 1], [], []>} : vector<16x32xf32>, vector<32x8xf32>, vector<16x8xf32> -> vector<16x8xf32>
    %c0_9 = arith.constant 0 : index
    %c0_10 = arith.constant 0 : index
    %c0_11 = arith.constant 0 : index
    %c0_12 = arith.constant 0 : index
    %7 = vector.load %arg6[%c0_9, %c0_10, %c0_11, %c0_12] : memref<1x3x1x8xf32, #tpu.memory_space<vmem>>, vector<1x1x1x8xf32>
    %8 = vector.shape_cast %7 : vector<1x1x1x8xf32> to vector<1x8xf32>
    %9 = vector.broadcast %8 : vector<1x8xf32> to vector<16x8xf32>
    %10 = arith.addf %6, %9 : vector<16x8xf32>
    %c0_13 = arith.constant 0 : index
    %c1 = arith.constant 1 : index
    %c0_14 = arith.constant 0 : index
    %c0_15 = arith.constant 0 : index
    %11 = vector.load %arg5[%c0_13, %c1, %c0_14, %c0_15] : memref<1x3x32x8xf32, #tpu.memory_space<vmem>>, vector<1x1x32x8xf32>
    %12 = vector.shape_cast %11 : vector<1x1x32x8xf32> to vector<32x8xf32>
    %cst_16 = arith.constant dense<0.000000e+00> : vector<32x8xf32>
    %13 = tpu.matmul %1, %12, %cst_16 {dimension_numbers = #tpu.dot_dimension_numbers<[1], [0], [0], [1], [0, 0, 1, 1], [], []>} : vector<32x32xf32>, vector<32x8xf32>, vector<32x8xf32> -> vector<32x8xf32>
    %c0_17 = arith.constant 0 : index
    %c1_18 = arith.constant 1 : index
    %c0_19 = arith.constant 0 : index
    %c0_20 = arith.constant 0 : index
    %14 = vector.load %arg6[%c0_17, %c1_18, %c0_19, %c0_20] : memref<1x3x1x8xf32, #tpu.memory_space<vmem>>, vector<1x1x1x8xf32>
    %15 = vector.shape_cast %14 : vector<1x1x1x8xf32> to vector<1x8xf32>
    %16 = vector.broadcast %15 : vector<1x8xf32> to vector<32x8xf32>
    %17 = arith.addf %13, %16 : vector<32x8xf32>
    %c0_21 = arith.constant 0 : index
    %c2 = arith.constant 2 : index
    %c0_22 = arith.constant 0 : index
    %c0_23 = arith.constant 0 : index
    %18 = vector.load %arg5[%c0_21, %c2, %c0_22, %c0_23] : memref<1x3x32x8xf32, #tpu.memory_space<vmem>>, vector<1x1x32x8xf32>
    %19 = vector.shape_cast %18 : vector<1x1x32x8xf32> to vector<32x8xf32>
    %cst_24 = arith.constant dense<0.000000e+00> : vector<32x8xf32>
    %20 = tpu.matmul %1, %19, %cst_24 {dimension_numbers = #tpu.dot_dimension_numbers<[1], [0], [0], [1], [0, 0, 1, 1], [], []>} : vector<32x32xf32>, vector<32x8xf32>, vector<32x8xf32> -> vector<32x8xf32>
    %c0_25 = arith.constant 0 : index
    %c2_26 = arith.constant 2 : index
    %c0_27 = arith.constant 0 : index
    %c0_28 = arith.constant 0 : index
    %21 = vector.load %arg6[%c0_25, %c2_26, %c0_27, %c0_28] : memref<1x3x1x8xf32, #tpu.memory_space<vmem>>, vector<1x1x1x8xf32>
    %22 = vector.shape_cast %21 : vector<1x1x1x8xf32> to vector<1x8xf32>
    %23 = vector.broadcast %22 : vector<1x8xf32> to vector<32x8xf32>
    %24 = arith.addf %20, %23 : vector<32x8xf32>
    %25 = vector.shape_cast %10 : vector<16x8xf32> to vector<2x8x8xf32>
    %26 = vector.shape_cast %17 : vector<32x8xf32> to vector<2x16x8xf32>
    %27 = vector.shape_cast %24 : vector<32x8xf32> to vector<2x16x8xf32>
    "tpu.trace_start"() <{level = 10 : i32, message = "bqd,bkd->bqk"}> : () -> ()
    %cst_29 = arith.constant dense<0.000000e+00> : vector<2x8x16xf32>
    %28 = tpu.matmul %25, %26, %cst_29 {dimension_numbers = #tpu.dot_dimension_numbers<[2], [2], [1], [1], [0, 0, 0, 1, 1, 1], [0], [0]>} : vector<2x8x8xf32>, vector<2x16x8xf32>, vector<2x8x16xf32> -> vector<2x8x16xf32>
    "tpu.trace_stop"() : () -> ()
    %c0_30 = arith.constant 0 : index
    %c0_31 = arith.constant 0 : index
    %c0_32 = arith.constant 0 : index
    %29 = vector.load %arg9[%c0_30, %c0_31, %c0_32] : memref<1x8x16xf32, #tpu.memory_space<vmem>>, vector<1x8x16xf32>
    %30 = vector.broadcast %29 : vector<1x8x16xf32> to vector<2x8x16xf32>
    %31 = arith.addf %28, %30 : vector<2x8x16xf32>
    %cst_33 = arith.constant dense<0xFF800000> : vector<2x8xf32>
    %32 = vector.multi_reduction <maximumf>, %31, %cst_33 [2] : vector<2x8x16xf32> to vector<2x8xf32>
    %33 = vector.shape_cast %32 : vector<2x8xf32> to vector<2x8x1xf32>
    %34 = vector.broadcast %33 : vector<2x8x1xf32> to vector<2x8x16xf32>
    %35 = arith.subf %31, %34 : vector<2x8x16xf32>
    %36 = math.exp %35 : vector<2x8x16xf32>
    %cst_34 = arith.constant dense<0.000000e+00> : vector<2x8xf32>
    %37 = vector.multi_reduction <add>, %36, %cst_34 [2] : vector<2x8x16xf32> to vector<2x8xf32>
    %38 = vector.shape_cast %37 : vector<2x8xf32> to vector<2x8x1xf32>
    %39 = tpu.reciprocal %38 : vector<2x8x1xf32> -> vector<2x8x1xf32>
    %40 = vector.broadcast %39 : vector<2x8x1xf32> to vector<2x8x16xf32>
    %41 = arith.mulf %36, %40 : vector<2x8x16xf32>
    %42 = vector.shape_cast %41 : vector<2x8x16xf32> to vector<2x1x8x16xf32>
    %c0_35 = arith.constant 0 : index
    %c0_36 = arith.constant 0 : index
    %c0_37 = arith.constant 0 : index
    %c0_38 = arith.constant 0 : index
    %43 = vector.load %arg11[%c0_35, %c0_36, %c0_37, %c0_38] : memref<2x1x8x16xf32, #tpu.memory_space<vmem>>, vector<2x1x8x16xf32>
    tpu.vector_store %arg11[%c0_35, %c0_36, %c0_37, %c0_38], %42 {strides = array<i32>} : memref<2x1x8x16xf32, #tpu.memory_space<vmem>>, vector<2x1x8x16xf32>,
    "tpu.trace_start"() <{level = 10 : i32, message = "bqk,bkd->bqd"}> : () -> ()
    %cst_39 = arith.constant dense<0.000000e+00> : vector<2x8x8xf32>
    %44 = tpu.matmul %41, %27, %cst_39 {dimension_numbers = #tpu.dot_dimension_numbers<[2], [1], [1], [2], [0, 0, 0, 1, 1, 2], [0], [0]>} : vector<2x8x16xf32>, vector<2x16x8xf32>, vector<2x8x8xf32> -> vector<2x8x8xf32>
    "tpu.trace_stop"() : () -> ()
    %45 = vector.shape_cast %44 : vector<2x8x8xf32> to vector<16x8xf32>
    %c0_40 = arith.constant 0 : index
    %c0_41 = arith.constant 0 : index
    %c0_42 = arith.constant 0 : index
    %46 = vector.load %arg7[%c0_40, %c0_41, %c0_42] : memref<1x8x32xf32, #tpu.memory_space<vmem>>, vector<1x8x32xf32>
    %47 = vector.shape_cast %46 : vector<1x8x32xf32> to vector<8x32xf32>
    %cst_43 = arith.constant dense<0.000000e+00> : vector<16x32xf32>
    %48 = tpu.matmul %45, %47, %cst_43 {dimension_numbers = #tpu.dot_dimension_numbers<[1], [0], [0], [1], [0, 0, 1, 1], [], []>} : vector<16x8xf32>, vector<8x32xf32>, vector<16x32xf32> -> vector<16x32xf32>
    %c0_i32 = arith.constant 0 : i32
    %49 = arith.cmpi eq, %arg2, %c0_i32 : i32
    %50 = arith.extui %49 : i1 to i32
    %c0_i32_44 = arith.constant 0 : i32
    %51 = arith.cmpi ne, %50, %c0_i32_44 : i32
    scf.if %51 {
      %c0_48 = arith.constant 0 : index
      %c0_49 = arith.constant 0 : index
      %58 = vector.load %arg12[%c0_48, %c0_49] : memref<16x32xf32, #tpu.memory_space<vmem>>, vector<16x32xf32>
      tpu.vector_store %arg12[%c0_48, %c0_49], %48 {strides = array<i32>} : memref<16x32xf32, #tpu.memory_space<vmem>>, vector<16x32xf32>,
    } else {
    }
    %c0_i32_45 = arith.constant 0 : i32
    %52 = arith.cmpi sgt, %arg2, %c0_i32_45 : i32
    %53 = arith.extui %52 : i1 to i32
    %c0_i32_46 = arith.constant 0 : i32
    %54 = arith.cmpi ne, %53, %c0_i32_46 : i32
    scf.if %54 {
      %c0_48 = arith.constant 0 : index
      %c0_49 = arith.constant 0 : index
      %58 = vector.load %arg12[%c0_48, %c0_49] : memref<16x32xf32, #tpu.memory_space<vmem>>, vector<16x32xf32>
      %59 = arith.addf %58, %48 : vector<16x32xf32>
      %c0_50 = arith.constant 0 : index
      %c0_51 = arith.constant 0 : index
      %60 = vector.load %arg12[%c0_50, %c0_51] : memref<16x32xf32, #tpu.memory_space<vmem>>, vector<16x32xf32>
      tpu.vector_store %arg12[%c0_50, %c0_51], %59 {strides = array<i32>} : memref<16x32xf32, #tpu.memory_space<vmem>>, vector<16x32xf32>,
    } else {
    }
    %c3_i32 = arith.constant 3 : i32
    %55 = arith.cmpi eq, %arg2, %c3_i32 : i32
    %56 = arith.extui %55 : i1 to i32
    %c0_i32_47 = arith.constant 0 : i32
    %57 = arith.cmpi ne, %56, %c0_i32_47 : i32
    scf.if %57 {
      %c0_48 = arith.constant 0 : index
      %c0_49 = arith.constant 0 : index
      %58 = vector.load %arg12[%c0_48, %c0_49] : memref<16x32xf32, #tpu.memory_space<vmem>>, vector<16x32xf32>
      %c0_50 = arith.constant 0 : index
      %c0_51 = arith.constant 0 : index
      %59 = vector.load %arg8[%c0_50, %c0_51] : memref<1x32xf32, #tpu.memory_space<vmem>>, vector<1x32xf32>
      %60 = vector.broadcast %59 : vector<1x32xf32> to vector<16x32xf32>
      %61 = arith.addf %58, %60 : vector<16x32xf32>
      %62 = vector.shape_cast %61 : vector<16x32xf32> to vector<2x8x32xf32>
      %c0_52 = arith.constant 0 : index
      %c0_53 = arith.constant 0 : index
      %c0_54 = arith.constant 0 : index
      %63 = vector.load %arg10[%c0_52, %c0_53, %c0_54] : memref<2x8x32xf32, #tpu.memory_space<vmem>>, vector<2x8x32xf32>
      tpu.vector_store %arg10[%c0_52, %c0_53, %c0_54], %62 {strides = array<i32>} : memref<2x8x32xf32, #tpu.memory_space<vmem>>, vector<2x8x32xf32>,
    } else {
    }
    return
  }
  func.func @transform_0(%arg0: i32, %arg1: i32, %arg2: i32) -> (i32, i32, i32) {
    %c0_i32 = arith.constant 0 : i32
    %c0_i32_0 = arith.constant 0 : i32
    %c0_i32_1 = arith.constant 0 : i32
    return %arg0, %c0_i32, %c0_i32_0 : i32, i32, i32
  }
  func.func @transform_1(%arg0: i32, %arg1: i32, %arg2: i32) -> (i32, i32, i32) {
    %c0_i32 = arith.constant 0 : i32
    %c0_i32_0 = arith.constant 0 : i32
    return %arg0, %arg1, %c0_i32 : i32, i32, i32
  }
  func.func @transform_2(%arg0: i32, %arg1: i32, %arg2: i32) -> (i32, i32, i32, i32) {
    %c0_i32 = arith.constant 0 : i32
    %c0_i32_0 = arith.constant 0 : i32
    %c0_i32_1 = arith.constant 0 : i32
    %c0_i32_2 = arith.constant 0 : i32
    return %arg2, %c0_i32, %c0_i32_0, %c0_i32_1 : i32, i32, i32, i32
  }
  func.func @transform_3(%arg0: i32, %arg1: i32, %arg2: i32) -> (i32, i32, i32, i32) {
    %c0_i32 = arith.constant 0 : i32
    %c0_i32_0 = arith.constant 0 : i32
    %c0_i32_1 = arith.constant 0 : i32
    %c0_i32_2 = arith.constant 0 : i32
    return %arg2, %c0_i32, %c0_i32_0, %c0_i32_1 : i32, i32, i32, i32
  }
  func.func @transform_4(%arg0: i32, %arg1: i32, %arg2: i32) -> (i32, i32, i32) {
    %c0_i32 = arith.constant 0 : i32
    %c0_i32_0 = arith.constant 0 : i32
    %c0_i32_1 = arith.constant 0 : i32
    return %arg2, %c0_i32, %c0_i32_0 : i32, i32, i32
  }
  func.func @transform_5(%arg0: i32, %arg1: i32, %arg2: i32) -> (i32, i32) {
    %c0_i32 = arith.constant 0 : i32
    %c0_i32_0 = arith.constant 0 : i32
    %c0_i32_1 = arith.constant 0 : i32
    return %c0_i32, %c0_i32_0 : i32, i32
  }
  func.func @transform_6(%arg0: i32, %arg1: i32, %arg2: i32) -> (i32, i32, i32) {
    %c0_i32 = arith.constant 0 : i32
    %c0_i32_0 = arith.constant 0 : i32
    %c0_i32_1 = arith.constant 0 : i32
    return %c0_i32, %arg1, %c0_i32_0 : i32, i32, i32
  }
  func.func @transform_7(%arg0: i32, %arg1: i32, %arg2: i32) -> (i32, i32, i32) {
    %c0_i32 = arith.constant 0 : i32
    %c0_i32_0 = arith.constant 0 : i32
    return %arg0, %arg1, %c0_i32 : i32, i32, i32
  }
  func.func @transform_8(%arg0: i32, %arg1: i32, %arg2: i32) -> (i32, i32, i32, i32) {
    %c0_i32 = arith.constant 0 : i32
    %c0_i32_0 = arith.constant 0 : i32
    return %arg0, %arg2, %arg1, %c0_i32 : i32, i32, i32, i32
  }
}

</mosaic_0001>

<bundles_post_ra>
// kernel: tpu_custom_call.1
= control target key start
LH: loop header
LB: loop body
LE: loop exit
PB: predicated region body
PF: predicated region fallthrough
CT: control target
= control target key end

     0   :  { %s2339_s0 = inlined_call_operand.vmem [shape: f32[2,16,32], index: 0, kind: input, shape index: {}]   ;;  %s2340_s1 = inlined_call_operand.vmem [shape: f32[2,16,32], index: 1, kind: input, shape index: {}]   ;;  %s2341_s2 = inlined_call_operand.vmem [shape: f32[4,3,32,8], index: 2, kind: input, shape index: {}]   ;;  %s2342_s3 = inlined_call_operand.vmem [shape: f32[4,3,1,8], index: 3, kind: input, shape index: {}]   ;;  %s2343_s4 = inlined_call_operand.vmem [shape: f32[4,8,32], index: 4, kind: input, shape index: {}]   ;;  %s2344_s5 = inlined_call_operand.vmem [shape: f32[1,32], index: 5, kind: input, shape index: {}]   ;;  %s2345_s6 = inlined_call_operand.vmem [shape: f32[1,16,16], index: 6, kind: input, shape index: {}]   ;;  %s2346_s7 = inlined_call_operand.hbm [shape: f32[2,16,32], index: 7, kind: output, shape index: {0}]   ;;  %s2347_s8 = inlined_call_operand.hbm [shape: f32[2,4,16,16], index: 8, kind: output, shape index: {1}]  }
   0x1   :  { %2360 = sst [smem:[#allocation16_spill]] %s2339_s0 }
   0x2   :  { %2361 = sst [smem:[#allocation17_spill]] %s2340_s1 }
   0x3   :  { %2362 = sst [smem:[#allocation18_spill]] %s2341_s2 }
   0x4   :  { %2363 = sst [smem:[#allocation19_spill]] %s2342_s3 }
   0x5   :  { %2364 = sst [smem:[#allocation20_spill]] %s2343_s4 }
   0x6   :  { %2365 = sst [smem:[#allocation21_spill]] %s2344_s5 }
   0x7   :  { %2366 = sst [smem:[#allocation22_spill]] %s2345_s6 }
   0x8   :  { %2367 = sst [smem:[#allocation23_spill]] %s2346_s7 }
   0x9   :  { %2368 = sst [smem:[#allocation24_spill]] %s2347_s8 }
   0xa   :  { %14 = vsyncpa [#allocation5], 0 }
   0xb   :  { %16 = vsyncpa [#allocation5 + $0x1], 0 }
   0xc   :  { %17 = vsyncpa [#allocation7], 0 }
   0xd   :  { %19 = vsyncpa [#allocation7 + $0x1], 0  ;;  %s1989_s27 = smov 0   ;;  %s1991_s28 = smov 0  }
   0xe   :  { %s1993_s29 = smov 0   ;;  %s1995_s30 = smov 0  }
   0xf   :  { %s1997_s9 = smov 0   ;;  %s1999_s10 = smov 0  }
  0x10   :  { %s2001_s11 = smov 0   ;;  %s2003_s12 = smov 0  }
  0x11   :  { %s2005_s13 = smov 0   ;;  %s2007_s14 = smov 0  }
  0x12   :  { %s2009_s15 = smov 0  }
  0x13 LB: > { %2369 = sst [smem:[#allocation10_spill]] %s1905_s30  ;;  %s1461_s16 = sadd.s32 4294967295, %s1933_s15   ;;  %s1933_s15 = sphi %s2009_s15, %s25_s15   ;;  %s1929_s14 = sphi %s2007_s14, %s2407_s14   ;;  %s1925_s13 = sphi %s2005_s13, %s2406_s13   ;;  %s1921_s12 = sphi %s2003_s12, %s2396_s12   ;;  %s1917_s11 = sphi %s2001_s11, %s2405_s11   ;;  %s1913_s10 = sphi %s1999_s10, %s2404_s10   ;;  %s1909_s9 = sphi %s1997_s9, %s2403_s9   ;;  %s1905_s30 = sphi %s1995_s30, %s2402_s30   ;;  %s1901_s29 = sphi %s1993_s29, %s2401_s29   ;;  %s1897_s28 = sphi %s1991_s28, %s2400_s28   ;;  %s1893_s27 = sphi %s1989_s27, %s2399_s27  }
  0x14   : > { %2370 = sst [smem:[#allocation11_spill]] %s1929_s14  ;;  %s1462_s17 = sadd.s32 4294967294, %s1933_s15  }
  0x15   : > { %s37_s18 = sadd.s32 1, %s1925_s13  ;;  %s40_s19 = sadd.s32 1, %s1929_s14 }
  0x16   : > { %p38_p0 = scmp.ge.s32.totalorder %s37_s18, 4  ;;  %s79_s20 = sadd.s32 1, %s1913_s10 }
  0x17   : > { %p86_p1 = scmp.ne.s32.totalorder %s1913_s10, %s1909_s9  ;;  %p87_p2 = scmp.eq.s32.totalorder %s1933_s15, 0 }
  0x18   : > { %s2409_s18 = smov (%p38_p0, %s37_s18), 0  ;;  %s2411_s19 = smov (!%p38_p0, %s40_s19), %s1929_s14 }
  0x19   : > { %2371 = sst [smem:[#allocation12_spill]] %s2409_s18  ;;  %p2055_p3 = por %p87_p2, %p86_p1 }
  0x1a   : > { %p2059_p4 = scmp.eq.s32.totalorder %s1461_s16, 7  ;;  %p42_p5 = scmp.ge.s32.totalorder %s2411_s19, 2 }
  0x1b   : > { %p248_p6 = scmp.ne.s32.totalorder %s1909_s9, %s1905_s30  ;;  %p2071_p8 = scmp.eq.s32.totalorder %s1462_s17, 7 }
  0x1c   : > { %p2067_p7 = por %p2059_p4, %p86_p1  ;;  %s2413_s19 = smov (%p42_p5, %s2411_s19), 0 }
  0x1d   : > { %2377 = sst [smem:[#allocation14_spill]] %s2413_s19  ;;  %p2079_p9 = por %p2071_p8, %p248_p6 }
  0x1e   : > { %s2374_s23 = scalar_select %p2067_p7, 1, 0 }
  0x1f   : > { %s2378_s25 = scalar_select %p2079_p9, 1, 0 }
  0x20   : > { %2375 = sst [smem:[#allocation13_spill]] %s2374_s23  ;;  %s256_s26 = ssub.s32 %s1925_s13, %s2409_s18 }
  0x21   : > { %2379 = sst [smem:[#allocation15_spill]] %s2378_s25  ;;  %s75_s16 = ssub.s32 %s1929_s14, %s2413_s19 }
  0x22   : > { %s262_s30 = sadd.s32 1, %s1901_s29  ;;  %p77_p10 = scmp.eq.s32.totalorder %s75_s16, 0 }
  0x23   : > { %s259_s8 = sor.u32 %s256_s26, %s75_s16  ;;  %p272_p12 = scmp.ne.s32.totalorder %s1901_s29, %s1897_s28 }
  0x24   : > { %p260_p11 = scmp.eq.s32.totalorder %s259_s8, 0  ;;  %p278_p0 = scmp.ne.s32.totalorder %s1897_s28, %s1893_s27 }
  0x25   : > { %s2091_s17 = scalar_select %p77_p10, %s1913_s10, %s79_s20  }
  0x26   : > { %s2094_s7 = scalar_select %p260_p11, %s1901_s29, %s262_s30  }
  0x27   : > { %p2098_p13 = por %p272_p12, %p2059_p4  ;;  %p2106_p1 = por %p278_p0, %p2071_p8 }
  0x28   : > { %p1465_p2 = scmp.ge.s32.totalorder %s1933_s15, 8 }
  0x2a   : > { %308 = sbr.rel (%p1465_p2) target bundleno = 60 (0x3c), region = 24 }
  0x31   : > { %311 = sbr.rel (!%p2055_p3) target bundleno = 60 (0x3c), region = 28  ;;  %s313_s8 = sand.u32 (%p2055_p3), 1, %s1913_s10  }
  0x32   : > { %s1467_s30 = sshll.u32 (%p2055_p3), %s1929_s14, 3  ;;  %s1466_s20 = sshll.u32 (%p2055_p3), %s313_s8, 4 }
  0x33   : > { %s2382_s1 = sld [smem:[#allocation17_spill]] (%p2055_p3)  ;;  %s315_s24 = scalar_lea.vmem (%p2055_p3), [#allocation3], %s1466_s20 }
  0x39   : > { %s320_s16 = scalar_lea.vmem %s2382_s1, %s1467_s30 }
  0x3a   : > { %v350_v0 = vld [vmem:[%s320_s16] sm:$0xff]  ;;  %v352_v1 = vld [vmem:[%s320_s16 + $0x10] sm:$0xff] }
  0x3b   : > { %351 = vst [vmem:[%s315_s24] sm:$0xff] %v350_v0  ;;  %353 = vst [vmem:[%s315_s24 + $0x8] sm:$0xff] %v352_v1 }
  0x3c PF: > { %p1468_p4 = scmp.ge.s32.totalorder %s1933_s15, 1  ;;  %p387_p3 = scmp.lt.s32.totalorder %s1933_s15, 9 }
  0x3e   : > { %p388_p5 = pnand %p1468_p4, %p387_p3 }
  0x3f   : > { %p463_p6 = scmp.lt.s32.totalorder (!%p388_p5), %s1917_s11, 3  ;;  %s2383_s0 = sld [smem:[#allocation16_spill]] (!%p388_p5)  ;;  %vm499_vm0 = vcmask (!%p388_p5), 261120   ;;  %v1935_v26 = vmov (!%p388_p5), 0.0|0.0   ;;  %vm1936_vm1 = vmmov (!%p388_p5), 0   ;;  %v1937_v27 = vmov (!%p388_p5), 0.0  }
  0x40   : > { %391 = sbr.rel (%p388_p5) target bundleno = 1346 (0x542), region = 82  ;;  %s2354_s30 = sand.u32 (!%p388_p5), 1, %s1909_s9   ;;  %vm790_vm2 = vcmask (!%p388_p5), 64512   ;;  %vm949_vm4 = vcmask (!%p388_p5), 130048  }
  0x41   : > { %s2128_s20 = sshll.u32 (!%p388_p5), %s2354_s30, 4  ;;  %s2384_s2 = sld [smem:[#allocation18_spill]] (!%p388_p5)  ;;  %vm1654_vm3 = vmpackc.low (!%p388_p5), %vm790_vm2, %vm790_vm2 }
  0x42   : > { %s396_s16 = scalar_lea.vmem (!%p388_p5), [#allocation3], %s2128_s20  ;;  %s2385_s3 = sld [smem:[#allocation19_spill]] (!%p388_p5) }
  0x43   : > { %v486_v3 = vld [vmem:[%s396_s16] sm:$0xff] (!%p388_p5)  ;;  %v487_v21 = vld [vmem:[%s396_s16 + $0x8] sm:$0xff] (!%p388_p5)  ;;  %p476_p8 = scmp.lt.s32.totalorder (!%p388_p5), %s1921_s12, 1  ;;  %s2386_s6 = sld [smem:[#allocation22_spill]] (!%p388_p5) }
  0x44   : > { %1564 = vmatprep.mubr.msk.f32.mxu0 (!%p388_p5), %vm499_vm0, %v486_v3  ;;  %s2355_s30 = sand.u32 (!%p388_p5), 1, %s1897_s28   ;;  %s2387_s4 = sld [smem:[#allocation20_spill]] (!%p388_p5) }
  0x45   : > { %v482_v2 = vld [vmem:[%s2383_s0] sm:$0xff] (!%p388_p5)  ;;  %v483_v19 = vld [vmem:[%s2383_s0 + $0x8] sm:$0xff] (!%p388_p5)  ;;  %v484_v20 = vld [vmem:[%s2383_s0 + $0x10] sm:$0xff] (!%p388_p5)  ;;  %s1471_s16 = sshll.u32 (!%p388_p5), %s2355_s30, 4  ;;  %p1508_p10 = scmp.ne.s32.totalorder (!%p388_p5), %s1917_s11, 0 }
  0x46   : > { %1575 = vmatprep.mubr.msk.f32.mxu1 (!%p388_p5), %vm499_vm0, %v482_v2  ;;  %v485_v22 = vld [vmem:[%s2383_s0 + $0x18] sm:$0xff] (!%p388_p5) }
  0x47   : > { %s2131_s22 = scalar_select %p463_p6, %s1917_s11, 3 }
  0x48   : > { %s477_s1 = scalar_select %p476_p8, %s1921_s12, 1 }
  0x49   : > { %s1666_s26 = smul.u32 96, %s2131_s22 }
  0x4a   : > { %s1474_s8 = sshll.u32 %s477_s1, 3  ;;  %s1473_s1 = sshll.u32 %s2131_s22, 3 }
  0x4b   : > { %s2139_s21 = scalar_lea.vmem %s2384_s2, %s1666_s26  ;;  %s1667_s2 = smul.u32 3, %s2131_s22 }
  0x4c   : > { %v1478_v4 = vld [vmem:[%s2139_s21 + $0x20] sm:$0xff]  ;;  %v1479_v5 = vld [vmem:[%s2139_s21 + $0x28] sm:$0xff]  ;;  %v1480_v6 = vld [vmem:[%s2139_s21 + $0x30] sm:$0xff]  ;;  %s475_s24 = scalar_lea.vmem %s2387_s4, %s1473_s1 }
  0x4d   : > { %v1636_v7 = vpack.c.bf16 %v1479_v5, %v1478_v4  ;;  %v1481_v8 = vld [vmem:[%s2139_s21 + $0x38] sm:$0xff]  ;;  %v488_v9 = vld [vmem:[%s2139_s21] sm:$0xff]  ;;  %v489_v10 = vld [vmem:[%s2139_s21 + $0x8] sm:$0xff] }
  0x4e   : > { %v1640_v11 = vpack.c.bf16 %v1481_v8, %v1480_v6  ;;  %v1628_v12 = vpack.c.bf16 %v489_v10, %v488_v9  ;;  %v490_v13 = vld [vmem:[%s2139_s21 + $0x10] sm:$0xff]  ;;  %v491_v14 = vld [vmem:[%s2139_s21 + $0x18] sm:$0xff]  ;;  %v1488_v16 = vld [vmem:[%s2139_s21 + $0x40] sm:$0xff] }
  0x4f   : > { %1637 = vmatprep.subr.bf16.mxu1 %v1636_v7  ;;  %v1632_v15 = vpack.c.bf16 %v491_v14, %v490_v13  ;;  %v1489_v17 = vld [vmem:[%s2139_s21 + $0x48] sm:$0xff]  ;;  %v1490_v23 = vld [vmem:[%s2139_s21 + $0x50] sm:$0xff]  ;;  %v1491_v24 = vld [vmem:[%s2139_s21 + $0x58] sm:$0xff]  ;;  %s471_s21 = scalar_lea.vmem %s2385_s3, %s1667_s2  ;;  %s479_s2 = scalar_lea.vmem %s2386_s6, %s1474_s8 }
  0x50   : > { %1639 = vmatpush3.bf16.msra.mxu1 %v1636_v7  ;;  %1629 = vmatprep.subr.bf16.mxu0 %v1628_v12  ;;  %v1644_v18 = vpack.c.bf16 %v1489_v17, %v1488_v16  ;;  %v1648_v25 = vpack.c.bf16 %v1491_v24, %v1490_v23  ;;  %v1483_v28 = vld [vmem:[%s471_s21 + $0x1] ss:$0 sm:$0xff]  ;;  %v1475_v40 = vld [vmem:[%s471_s21] ss:$0 sm:$0xff]  ;;  %v1493_v44 = vld [vmem:[%s471_s21 + $0x2] ss:$0 sm:$0xff] }
  0x51   : > { %1641 = vmatprep.subr.bf16.mxu1 %v1640_v11  ;;  %1631 = vmatpush3.bf16.msra.mxu0 %v1628_v12  ;;  %v789_v55 = vld [vmem:[%s479_s2] sm:$0xff]  ;;  %s2196_s21 = scalar_lea.vmem [#allocation6], %s1471_s16  ;;  %s447_s2 = scalar_lea.vmem [#allocation4], %s2128_s20 }
  0x52   : > { %1633 = vmatprep.subr.bf16.mxu0 %v1632_v15  ;;  %v1120_v16 = vld [vmem:[%s475_s24] sm:$0xff] }
  0x54   : > { %1643 = vmatpush3.bf16.msra.mxu1 %v1640_v11 }
  0x55   : > { %1635 = vmatpush3.bf16.msra.mxu0 %v1632_v15  ;;  %1652 = vmatprep.subr.bf16.mxu1 %v1935_v26 }
  0x56   : > { %1645 = vmatprep.subr.bf16.mxu0 %v1644_v18 }
  0x57   : > { %1576 = vmatmul.mubr.msk.f32.vlgmr.msra.gmra.mrb[0].mxu1 %vm499_vm0, %v483_v19 }
  0x58   : > { %1578 = vmatprep.mubr.msk.f32.mxu1 %vm499_vm0, %v484_v20  ;;  %1565 = vmatmul.mubr.msk.f32.vlgmr.msra.gmra.mrb[0].mxu0 %vm499_vm0, %v487_v21 }
  0x59   : > { %1647 = vmatpush3.bf16.msra.mxu0 %v1644_v18  ;;  %1589 = vmatprep.mubr.msk.f32.mxu0 %vm499_vm0, %v482_v2 }
  0x5a   : > { %1649 = vmatprep.subr.bf16.mxu0 %v1648_v25 }
  0x5b   : > { %1579 = vmatmul.mubr.msk.f32.gmra.mrb[2].mxu1 %vm499_vm0, %v485_v22 }
  0x5c   : > { %1599 = vmatprep.mubr.msk.f32.mxu1 %vm1936_vm1, %v1937_v27 }
  0x5d   : > { %1651 = vmatpush3.bf16.msra.mxu0 %v1648_v25 }
  0x5e   : > { %1656 = vmatprep.subr.bf16.mxu0 %v1935_v26 }
  0x60   : > { %1590 = vmatmul.mubr.msk.f32.vlgmr.msra.gmra.mrb[2].mxu0 %vm499_vm0, %v483_v19 }
  0x61   : > { %1592 = vmatprep.mubr.msk.f32.mxu0 %vm499_vm0, %v484_v20 }
  0x64   : > { %1593 = vmatmul.mubr.msk.f32.gmra.mrb[4].mxu0 %vm499_vm0, %v485_v22 }
  0x65   : > { %1606 = vmatprep.mubr.msk.f32.mxu0 %vm1936_vm1, %v1937_v27 }
 0x12a   : > { %v1577_v29 = vpop.f32.mrb[0].mxu1 }
 0x12b   : > { %v678_v30 = vadd.f32 %v1577_v29, %v1483_v28  ;;  %v672_v31 = vpop.f32.mrb[1].mxu1  ;;  %v1566_v32 = vpop.f32.mrb[0].mxu0 }
 0x12c   : > { %v673_v33 = vadd.f32 %v1483_v28, %v672_v31  ;;  %v572_v34 = vpop.f32.mrb[1].mxu0  ;;  %v578_v43 = vadd.f32 %v1566_v32, %v1475_v40 }
 0x12d   : > { %v573_v42 = vadd.f32 %v1475_v40, %v572_v34 }
 0x12e   : > { %v1653_v35 = vpack.c.bf16 %v678_v30, %v673_v33  ;;  %v1580_v36 = vpop.f32.mrb[2].mxu1 }
 0x12f   : > { %v688_v37 = vadd.f32 %v1580_v36, %v1483_v28  ;;  %v682_v38 = vpop.f32.mrb[3].mxu1 }
 0x130   : > { %v683_v39 = vadd.f32 %v1483_v28, %v682_v38  ;;  %1655 = vmatpush3.bf16.xpose.msk.msra.mxu1 %vm1654_vm3, %v1653_v35 }
 0x131   : > { %1660 = vmatprep.subr.bf16.mxu1 %v1935_v26 }
 0x132   : > { %v1657_v41 = vpack.c.bf16 %v688_v37, %v683_v39 }
 0x133   : > { %v1591_v45 = vpop.f32.mrb[2].mxu0 }
 0x134   : > { %1659 = vmatpush3.bf16.xpose.msk.msra.mxu0 %vm1654_vm3, %v1657_v41  ;;  %v776_v46 = vadd.f32 %v1591_v45, %v1493_v44  ;;  %v770_v47 = vpop.f32.mrb[3].mxu0 }
 0x135   : > { %v771_v48 = vadd.f32 %v1493_v44, %v770_v47  ;;  %1623 = vmatprep.subr.mxu0 %v1120_v16 }
 0x137   : > { %1600 = vmatmul.mubr.msk.f32.vlgmr.msra.gmra.mrb[4].mxu1 %vm790_vm2, %v573_v42  ;;  %v1661_v49 = vpack.c.bf16 %v776_v46, %v771_v48  ;;  %v1594_v50 = vpop.f32.mrb[4].mxu0 }
 0x138   : > { %1613 = vmatprep.mubr.msk.f32.mxu1 %vm1936_vm1, %v1937_v27  ;;  %v786_v51 = vadd.f32 %v1594_v50, %v1493_v44  ;;  %v780_v52 = vpop.f32.mrb[5].mxu0 }
 0x139   : > { %1662 = vmatpush3.bf16.msra.mxu1 %v1661_v49  ;;  %v781_v53 = vadd.f32 %v1493_v44, %v780_v52 }
 0x13a   : > { %1663 = vmatprep.subr.bf16.mxu1 %v1935_v26 }
 0x13b   : > { %1607 = vmatmul.mubr.msk.f32.vlgmr.msra.gmra.mrb[6].mxu0 %vm790_vm2, %v578_v43  ;;  %v1664_v54 = vpack.c.bf16 %v786_v51, %v781_v53 }
 0x13c   : > { %1624 = vmatpush3.msra.mxu0 %v1120_v16 }
 0x20a   : > { %v866_v56 = vpop.f32.mrb[4].mxu1 }
 0x20b   : > { %v867_v57 = vadd.f32 %v866_v56, %v789_v55  ;;  %v1601_v58 = vpop.f32.mrb[5].mxu1 }
 0x20d   : > { %v950_v59 = vsel %vm949_vm4, %v867_v57, -inf }
 0x20e   : > { %v945_v60 = vpop.f32.mrb[6].mxu0  ;;  %951 = vmax.xlane.f32.xlu0 %v950_v59 }
 0x20f   : > { %v946_v61 = vadd.f32 %v945_v60, %v789_v55  ;;  %v1608_v62 = vpop.f32.mrb[7].mxu0 }
 0x211   : > { %v953_v63 = vsel %vm949_vm4, %v946_v61, -inf }
 0x212   : > { %954 = vmax.xlane.f32.xlu0 %v953_v63 }
 0x29b   : > { %v952_v0 = vpop.xlane.xlu0 %951 }
 0x29c   : > { %v956_v1 = vsub.f32 %v867_v57, %v952_v0 }
 0x29e   : > { %v958_v2 = vmul.f32 1.442695, %v956_v1 }
 0x29f   : > { %v955_v3 = vpop.xlane.xlu0 %954 }
 0x2a0   : > { %1775 = vpow2.f32 %v958_v2  ;;  %v957_v4 = vsub.f32 %v946_v61, %v955_v3 }
 0x2a2   : > { %v960_v5 = vmul.f32 1.442695, %v957_v4 }
 0x2a4   : > { %1777 = vpow2.f32 %v960_v5 }
 0x2aa   : > { %v1776_v6 = vpop.eup %1775 }
 0x2ab   : > { %v962_v7 = vsel %vm949_vm4, %v1776_v6, 0.0 }
 0x2ac   : > { %963 = vadd.xlane.f32.xlu1 %v962_v7 }
 0x2ae   : > { %v1778_v8 = vpop.eup %1777 }
 0x2af   : > { %v965_v9 = vsel %vm949_vm4, %v1778_v8, 0.0 }
 0x2b0   : > { %966 = vadd.xlane.f32.xlu1 %v965_v9 }
 0x339   : > { %v964_v10 = vpop.xlane.xlu1 %963 }
 0x33a   : > { %1779 = vrcp.f32 %v964_v10 }
 0x33d   : > { %v967_v11 = vpop.xlane.xlu1 %966 }
 0x33e   : > { %1781 = vrcp.f32 %v967_v11 }
 0x344   : > { %v1780_v12 = vpop.eup %1779 }
 0x345   : > { %v970_v13 = vmul.f32 %v1780_v12, %v1776_v6 }
 0x347   : > { %972 = vst.msk [vmem:[%s2196_s21] sm:$0xff] %vm949_vm4, %v970_v13  ;;  %1614 = vmatmul.mubr.msk.f32.vlgmr.msra.gmra.mrb[6].mxu1 %vm949_vm4, %v970_v13 }
 0x348   : > { %v1782_v14 = vpop.eup %1781  ;;  %1665 = vmatpush3.bf16.msra.mxu1 %v1664_v54  ;;  %1620 = vmatprep.mubr.msk.f32.mxu1 %vm1936_vm1, %v1937_v27 }
 0x349   : > { %v971_v15 = vmul.f32 %v1782_v14, %v1778_v8 }
 0x34b   : > { %973 = vst.msk [vmem:[%s2196_s21 + $0x8] sm:$0xff] %vm949_vm4, %v971_v15  ;;  %1621 = vmatmul.mubr.msk.f32.vlgmr.msra.gmra.mrb[8].mxu1 %vm949_vm4, %v971_v15 }
 0x41a   : > { %v1043_v17 = vpop.f32.mrb[6].mxu1 }
 0x41b   : > { %v1615_v18 = vpop.f32.mrb[7].mxu1  ;;  %1625 = vmatprep.mubr.msk.f32.mxu0 %vm790_vm2, %v1043_v17 }
 0x41e   : > { %v1116_v19 = vpop.f32.mrb[8].mxu1 }
 0x41f   : > { %v1622_v20 = vpop.f32.mrb[9].mxu1  ;;  %1626 = vmatmul.mubr.msk.f32.vlgmr.msra.gmra.mrb[8].mxu0 %vm790_vm2, %v1116_v19 }
 0x4ed   : > { %1205 = sbr.rel (%p1508_p10) target bundleno = 1269 (0x4f5), region = 90 }
 0x4f2   : > { %v1627_v21 = vpop.f32.mrb[8].mxu0 }
 0x4f3   : > { %v1193_v22 = vpop.f32.mrb[9].mxu0  ;;  %1207 = vst.msk [vmem:[#allocation2 + $0x8] sm:$0xff] (!%p1508_p10), %vm499_vm0, %v1627_v21 }
 0x4f4   : > { %1206 = vst.msk [vmem:[#allocation2] sm:$0xff] %vm499_vm0, %v1193_v22 }
 0x4f5 PF: > { %p1509_p11 = scmp.le.s32.totalorder %s1917_s11, 0 }
 0x4f7   : > { %1211 = sbr.rel (%p1509_p11) target bundleno = 1279 (0x4ff), region = 94 }
 0x4fb   : > { %v1212_v23 = vld [vmem:[#allocation2] sm:$0xff] (!%p1509_p11)  ;;  %v1213_v24 = vld [vmem:[#allocation2 + $0x8] sm:$0xff] (!%p1509_p11) }
 0x4fc   : > { %v1214_v25 = vadd.f32 (!%p1509_p11), %v1212_v23, %v1193_v22  ;;  %v1215_v26 = vadd.f32 (!%p1509_p11), %v1627_v21, %v1213_v24 }
 0x4fe   : > { %1216 = vst.msk [vmem:[#allocation2] sm:$0xff] %vm499_vm0, %v1214_v25  ;;  %1217 = vst.msk [vmem:[#allocation2 + $0x8] sm:$0xff] %vm499_vm0, %v1215_v26 }
 0x4ff PF: > { %p1510_p12 = scmp.ne.s32.totalorder %s1917_s11, 3 }
 0x500   : > { %s2388_s5 = sld [smem:[#allocation21_spill]] (!%p1510_p12) }
 0x501   : > { %1221 = sbr.rel (%p1510_p12) target bundleno = 1290 (0x50a), region = 98 }
 0x505   : > { %v1222_v27 = vld [vmem:[#allocation2] sm:$0xff] (!%p1510_p12)  ;;  %v1223_v29 = vld [vmem:[#allocation2 + $0x8] sm:$0xff] (!%p1510_p12) }
 0x506   : > { %v1511_v28 = vld [vmem:[%s2388_s5] ss:$0 sm:$0xff] (!%p1510_p12) }
 0x507   : > { %v1231_v30 = vadd.f32 (!%p1510_p12), %v1511_v28, %v1222_v27  ;;  %v1232_v31 = vadd.f32 (!%p1510_p12), %v1511_v28, %v1223_v29 }
 0x509   : > { %1233 = vst.msk [vmem:[%s447_s2] sm:$0xff] %vm499_vm0, %v1231_v30  ;;  %1234 = vst.msk [vmem:[%s447_s2 + $0x8] sm:$0xff] %vm499_vm0, %v1232_v31 }
 0x50a PF: > { %s1514_s1 = sshll.u32 %s1921_s12, 7  ;;  %s2390_s24 = sld [smem:[#allocation23_spill]] }
 0x50b   : > { %s1256_s0 = sshll.u32 %s447_s2, 4  ;;  %s2391_s20 = sand.u32 1, %s1909_s9   ;;  %s2231_s0 = int_to_ptr.vmem [resolvable:$true] %s1256_s0 }
 0x50c   : > { %s2235_s22 = scalar_lea.sflag [#allocation5], %s2391_s20  ;;  %s1783_s3 = scalar_lea.vmem %s2231_s0, 256 }
 0x50d   : > { %p1784_p0 = scmp.ne.s32.totalorder %s2231_s0, %s1783_s3  ;;  %s1938_s4 = smov [#allocation4]  }
 0x50e   : > { %s1787_s5 = sshll.u32 %s1938_s4, 4  ;;  %s1788_s5 = int_to_ptr.vmem [resolvable:$false] %s1787_s5 }
 0x50f   : > { %p1785_p2 = pnand %p1784_p0, %p2067_p7  ;;  %s1789_s8 = scalar_lea.vmem %s1788_s5, 512 }
 0x510   : > { %s2229_s30 = scalar_lea.hbm %s2390_s24, %s1514_s1  ;;  %p1790_p3 = scmp.lt.s32.totalorder %s2231_s0, %s1788_s5 }
 0x511   : > { %p1786_p4 = pneg %p1785_p2  ;;  %p1791_p5 = scmp.lt.s32.totalorder %s1789_s8, %s1783_s3 }
 0x513   : > { %p1792_p6 = por %p1791_p5, %p1790_p3 }
 0x515   : > { %p1793_p8 = pnand %p1792_p6, %p1786_p4 }
 0x517   : > { %1796 = shalt.err (!%p1793_p8)
}
 0x518   : > { %s1797_s2 = scalar_lea.hbm %s2229_s30, 256  ;;  %s1801_s4 = scalar_lea.hbm %s2390_s24, 512 }
 0x519   : > { %p1798_p10 = scmp.ne.s32.totalorder %s2229_s30, %s1797_s2  ;;  %p1802_p0 = scmp.lt.u32.totalorder %s2229_s30, %s2390_s24 }
 0x51a   : > { %p1803_p2 = scmp.lt.u32.totalorder %s1801_s4, %s1797_s2  ;;  %p1805_p3 = scmp.lt.u32.totalorder %s1797_s2, %s2229_s30 }
 0x51b   : > { %p1799_p11 = pnand %p1798_p10, %p2067_p7 }
 0x51c   : > { %p1804_p4 = por %p1803_p2, %p1802_p0 }
 0x51d   : > { %p1800_p12 = pneg %p1799_p11 }
 0x51e   : > { %p1806_p5 = por %p1805_p3, %p1804_p4 }
 0x520   : > { %p1807_p6 = pnand %p1806_p5, %p1800_p12 }
 0x522   : > { %1810 = shalt.err (!%p1807_p6)
}
 0x523   : > { %s1939_s3 = smov 128   ;;  %s1940_s8 = smov 256  }
 0x524   : > { %s1941_s1 = smov 8   ;;  %s1515_s2 = sshll.u32 %s1917_s11, 1 }
 0x525   : > { %1668 = dma.vmem_to_hbm [thread:$0]  (%p2067_p7), %s2231_s0, 256, %s2229_s30, %s2235_s22, %s1939_s3, %s1940_s8, %s1941_s1  }
 0x526   : > { %s1271_s26 = sadd.s32 %s1921_s12, %s1515_s2  ;;  %s1276_s4 = sshll.u32 %s2196_s21, 4  ;;  %s2264_s4 = int_to_ptr.vmem [resolvable:$true] %s1276_s4 }
 0x527   : > { %s1516_s20 = sshll.u32 %s1271_s26, 7  ;;  %s2392_s24 = sld [smem:[#allocation24_spill]] }
 0x528   : > { %s2393_s18 = sand.u32 1, %s1897_s28   ;;  %s1811_s16 = scalar_lea.vmem %s2264_s4, 256 }
 0x529   : > { %s2273_s14 = scalar_lea.sflag [#allocation7], %s2393_s18  ;;  %p1812_p8 = scmp.ne.s32.totalorder %s2264_s4, %s1811_s16 }
 0x52a   : > { %s1942_s0 = smov [#allocation6]  }
 0x52b   : > { %p1813_p7 = pnand %p1812_p8, %p2098_p13  ;;  %s1815_s11 = sshll.u32 %s1942_s0, 4  ;;  %s1816_s11 = int_to_ptr.vmem [resolvable:$false] %s1815_s11 }
 0x52c   : > { %s1817_s12 = scalar_lea.vmem %s1816_s11, 512  ;;  %p1818_p11 = scmp.lt.s32.totalorder %s2264_s4, %s1816_s11 }
 0x52d   : > { %s2269_s19 = scalar_lea.hbm %s2392_s24, %s1516_s20  ;;  %p1814_p10 = pneg %p1813_p7 }
 0x52e   : > { %p1819_p12 = scmp.lt.s32.totalorder %s1817_s12, %s1811_s16 }
 0x530   : > { %p1820_p0 = por %p1819_p12, %p1818_p11 }
 0x532   : > { %p1821_p2 = pnand %p1820_p0, %p1814_p10 }
 0x534   : > { %1824 = shalt.err (!%p1821_p2)
}
 0x535   : > { %s1825_s6 = scalar_lea.hbm %s2269_s19, 256  ;;  %s1829_s21 = scalar_lea.hbm %s2392_s24, 2048 }
 0x536   : > { %p1826_p4 = scmp.ne.s32.totalorder %s2269_s19, %s1825_s6  ;;  %p1830_p6 = scmp.lt.u32.totalorder %s2269_s19, %s2392_s24 }
 0x537   : > { %p1831_p8 = scmp.lt.u32.totalorder %s1829_s21, %s1825_s6  ;;  %p1833_p10 = scmp.lt.u32.totalorder %s1825_s6, %s2269_s19 }
 0x538   : > { %p1827_p3 = pnand %p1826_p4, %p2098_p13 }
 0x539   : > { %p1832_p7 = por %p1831_p8, %p1830_p6 }
 0x53a   : > { %p1828_p5 = pneg %p1827_p3 }
 0x53b   : > { %p1834_p11 = por %p1833_p10, %p1832_p7 }
 0x53d   : > { %p1835_p12 = pnand %p1834_p11, %p1828_p5 }
 0x53f   : > { %1838 = shalt.err (!%p1835_p12)
}
 0x540   : > { %s1943_s2 = smov 1024  }
 0x541   : > { %1669 = dma.vmem_to_hbm [thread:$0]  (%p2098_p13), %s2264_s4, 256, %s2269_s19, %s2273_s14, %s1939_s3, %s1943_s2, %s1941_s1  }
 0x542 PF: > { %s2394_s26 = sld [smem:[#allocation10_spill]]  ;;  %p1679_p0 = scmp.ge.s32.totalorder %s1933_s15, 2 }
 0x544   : > { %p1673_p2 = pnand %p1679_p0, %p2079_p9 }
 0x548   : > { %s1291_s5 = sand.u32 1, %s2394_s26  }
 0x549   : > { %s1292_s16 = scalar_lea.sflag [#allocation5], %s1291_s5 }
 0x54a   : > { %1884 = dma.done.wait (!%p1673_p2), %s1292_s16, 256  }
 0x54b   : > { %1886 = vsyncadd (!%p1673_p2), %s1292_s16, 4294967040  ;;  %s1300_s23 = sand.u32 1, %s1893_s27   ;;  %p1676_p4 = pnand %p1679_p0, %p2106_p1 }
 0x54c   : > { %s1301_s0 = scalar_lea.sflag [#allocation7], %s1300_s23 }
 0x54d   : > { %1888 = dma.done.wait (!%p1676_p4), %s1301_s0, 256  }
 0x54e   : > { %1890 = vsyncadd (!%p1676_p4), %s1301_s0, 4294967040  ;;  %s25_s15 = sadd.s32 1, %s1933_s15   ;;  %s2396_s12 = sld [smem:[#allocation11_spill]] }
 0x54f   : > { %p22_p13 = scmp.ge.s32.totalorder %s25_s15, 10   ;;  %s2397_s14 = sld [smem:[#allocation12_spill]] }
 0x550   : > { %s2398_s19 = sld [smem:[#allocation14_spill]]  ;;  %s2399_s27 = smov %s1897_s28 }
 0x551   : > { %s2400_s28 = smov %s1901_s29  ;;  %s2401_s29 = smov %s2094_s7 }
 0x552   : > { %s2402_s30 = smov %s1909_s9  ;;  %s2403_s9 = smov %s1913_s10 }
 0x553   : > { %s2404_s10 = smov %s2091_s17  ;;  %s2405_s11 = smov %s1925_s13 }
 0x554   :  { %24 = sbr.rel (!%p22_p13) target bundleno = 19 (0x13), region = 174 }
 0x555   : > { %s2406_s13 = smov %s2397_s14 }
 0x556   : > { %s2407_s14 = smov %s2398_s19 }
 0x55b   :  { %1306 = vsyncpa [#allocation5], 1 }
 0x55c   :  { %1308 = vsyncpa [#allocation5 + $0x1], 1 }
 0x55d   :  { %1309 = vsyncpa [#allocation7], 1 }
 0x55e   :  { %1311 = vsyncpa [#allocation7 + $0x1], 1 }

</bundles_post_ra>
